<compile_context>
chip_gen: v7x
topology: tpu7x:2x2x1
jax: 0.10.0
libtpu: 0.0.40
codegen_flags: <defaults>
</compile_context>

<pallas_src>
import jax
import jax.numpy as jnp
from jax.experimental import pallas as pl
from jax.experimental.pallas import tpu as pltpu

_LANE = 512          # lane-dense last dim (4x128 lanes): long contiguous u8 rows
_TILE_ROWS = 2048    # 4 MiB f32 in + 1 MiB u8 out per block (10 MiB double-buffered)
_SMALL_ROWS = 256    # <= 512 KiB f32 input: single block, no grid/step overhead


def _round_up(x: int, m: int) -> int:
    return ((x + m - 1) // m) * m


def _cast_kernel(x_ref, o_ref):
    # Truncate toward zero, then modular-narrow to 8 bits (C-style cast).
    # Two VPU converts, fully hidden under the HBM copy (kernel is DMA-bound
    # at 5 B/elem), so no further compute-side tuning is warranted.
    o_ref[...] = x_ref[...].astype(jnp.int32).astype(jnp.uint8)


def cast_f32_to_u8(x: jax.Array) -> jax.Array:
    """Reproduces torch `inputs.type(torch.uint8)` for a float32 tensor."""
    orig_shape = x.shape
    n = x.size

    # Present the data as a lane-dense (rows, 512) slab.  Padding is a
    # Python-level branch: for n % 512 == 0 (the spec's 2x4x16x16 case)
    # NO extra ops are traced.
    pad = (-n) % _LANE
    x_flat = jnp.reshape(x, (-1,))
    if pad:
        x_flat = jnp.pad(x_flat, (0, pad))  # single fused op, rare path
    rows = x_flat.size // _LANE
    x2d = jnp.reshape(x_flat, (rows, _LANE))

    if rows <= _SMALL_ROWS:
        # Tiny input: one block == full array (launch-overhead dominated).
        block_rows = rows
    else:
        # Large input: row-tiled, double-buffered by BlockSpec.
        #  - cap at _TILE_ROWS (4 MiB f32 per step),
        #  - keep >= ~8 grid steps so v7x can shard across both TCs,
        #  - multiple of 32 rows -> unmasked packed u8 stores per block.
        block_rows = min(_TILE_ROWS, _round_up(pl.cdiv(rows, 8), 32))
    grid = (pl.cdiv(rows, block_rows),)

    # Explicit scoped-VMEM sizing: double-buffered (f32 in + u8 out) + 25%
    # headroom, floor 4 MiB.  Max ~12.5 MiB -> safe on v5e (16 MiB default
    # scoped), v6e/v7x (32 MiB), and well under v7x's 64 MiB physical.
    block_bytes = block_rows * _LANE * (4 + 1)
    vmem_limit = max(4 * 1024 * 1024, (2 * block_bytes * 5) // 4)

    out2d = pl.pallas_call(
        _cast_kernel,
        out_shape=jax.ShapeDtypeStruct((rows, _LANE), jnp.uint8),
        grid=grid,
        in_specs=[pl.BlockSpec((block_rows, _LANE), lambda i: (i, 0))],
        out_specs=pl.BlockSpec((block_rows, _LANE), lambda i: (i, 0)),
        compiler_params=pltpu.CompilerParams(
            # Elementwise: every grid step is independent -> shard across
            # TensorCores on v7x for free; harmless elsewhere.
            dimension_semantics=("parallel",),
            vmem_limit_bytes=vmem_limit,
        ),
    )(x2d)

    if pad:
        out_flat = jnp.reshape(out2d, (-1,))[:n]
        return jnp.reshape(out_flat, orig_shape)
    return jnp.reshape(out2d, orig_shape)


if __name__ == "__main__":
    key = jax.random.PRNGKey(0)
    # Values in [0, 200): identical result under PyTorch's C-style cast,
    # the kernel's truncate->wrap path, and plain XLA convert.
    x = jax.random.uniform(
        key, (2, 4, 16, 16), dtype=jnp.float32, minval=0.0, maxval=200.0
    )

    out = cast_f32_to_u8(x)
    out = jax.block_until_ready(out)

    # Reference: plain JAX truncating cast (equal on the in-range inputs).
    ref = x.astype(jnp.uint8)
    assert out.shape == (2, 4, 16, 16)
    assert out.dtype == jnp.uint8
    assert bool(jnp.all(out == ref))

    print("KERNEL_OK")
</pallas_src>

<mosaic_0001>
module attributes {stable_mosaic.version = 11 : i64} {
  func.func @_cast_kernel(%arg0: i32, %arg1: memref<4x512xf32, #tpu.memory_space<vmem>>, %arg2: memref<4x512xi8, #tpu.memory_space<vmem>>) attributes {dimension_semantics = [#tpu.dimension_semantics<parallel>], iteration_bounds = array<i64: 1>, scalar_prefetch = 0 : i64, scratch_operands = 0 : i64, tpu.core_type = #tpu.core_type<tc>, window_params = [{transform_indices = @transform_0, window_bounds = array<i64: 4, 512>}, {transform_indices = @transform_1, window_bounds = array<i64: 4, 512>}]} {
    %c0 = arith.constant 0 : index
    %c0_0 = arith.constant 0 : index
    %0 = vector.load %arg1[%c0, %c0_0] : memref<4x512xf32, #tpu.memory_space<vmem>>, vector<4x512xf32>
    %1 = arith.fptosi %0 : vector<4x512xf32> to vector<4x512xi32>
    %2 = arith.trunci %1 : vector<4x512xi32> to vector<4x512xi8>
    %c0_1 = arith.constant 0 : index
    %c0_2 = arith.constant 0 : index
    %3 = vector.load %arg2[%c0_1, %c0_2] : memref<4x512xi8, #tpu.memory_space<vmem>>, vector<4x512xi8>
    tpu.vector_store %arg2[%c0_1, %c0_2], %2 {strides = array<i32>} : memref<4x512xi8, #tpu.memory_space<vmem>>, vector<4x512xi8>,
    return
  }
  func.func @transform_0(%arg0: i32) -> (i32, i32) {
    %c0_i32 = arith.constant 0 : i32
    %c0_i32_0 = arith.constant 0 : i32
    return %arg0, %c0_i32 : i32, i32
  }
  func.func @transform_1(%arg0: i32) -> (i32, i32) {
    %c0_i32 = arith.constant 0 : i32
    %c0_i32_0 = arith.constant 0 : i32
    return %arg0, %c0_i32 : i32, i32
  }
}

</mosaic_0001>

<bundles_post_ra>
// kernel: tpu_custom_call.1
= control target key start
LH: loop header
LB: loop body
LE: loop exit
PB: predicated region body
PF: predicated region fallthrough
CT: control target
= control target key end

     0   :  { %6 = vsyncpa [#allocation3], 0  ;;  %s170_s0 = inlined_call_operand.hbm [shape: f32[4,512], index: 0, kind: input, shape index: {}]   ;;  %s171_s1 = inlined_call_operand.hbm [shape: u8[4,512], index: 1, kind: output, shape index: {}]  }
   0x1   :  { %7 = vsyncpa [#allocation4], 0  ;;  %s133_s6 = smov [#allocation2]   ;;  %s85_s10 = scalar_lea.hbm %s170_s0, 256 }
   0x2   :  { %s14_s7 = sshll.u32 %s133_s6, 4  ;;  %p86_p0 = scmp.ne.s32.totalorder %s170_s0, %s85_s10  ;;  %s15_s7 = int_to_ptr.vmem [resolvable:$true] %s14_s7 }
   0x3   :  { %p89_p1 = scmp.lt.u32.totalorder %s85_s10, %s170_s0 }
   0x5   :  { %p91_p2 = pnand %p89_p1, %p86_p0 }
   0x7   :  { %94 = shalt.err (!%p91_p2)
}
   0x8   :  { %s95_s15 = scalar_lea.vmem %s15_s7, 256  ;;  %p100_p4 = scmp.lt.s32.totalorder %s15_s7, %s15_s7 }
   0x9   :  { %p96_p3 = scmp.ne.s32.totalorder %s15_s7, %s95_s15  ;;  %p101_p5 = scmp.lt.s32.totalorder %s95_s15, %s95_s15 }
   0xb   :  { %p102_p6 = por %p101_p5, %p100_p4 }
   0xd   :  { %p103_p7 = pnand %p102_p6, %p96_p3 }
   0xf   :  { %106 = shalt.err (!%p103_p7)
}
  0x10   :  { %17 = dma.hbm_to_vmem [thread:$0]  %s170_s0, 256, %s15_s7, [#allocation3]  }
  0x11   :  { %129 = dma.done.wait [#allocation3], 256  }
  0x12   :  { %130 = vsyncadd [#allocation3], 4294967040  ;;  %v134_v0 = vmov 1966171168   ;;  %v40_v2 = vlaneseq  ;;  %v21_v3 = vld [vmem:[#allocation2] sm:$0xff]  ;;  %v22_v4 = vld [vmem:[#allocation2 + $0x8] sm:$0xff] }
  0x13   :  { %v38_v1 = vunpack.c.l.s4 %v134_v0  ;;  %v78_v5 = vtrunc.f32 %v21_v3  ;;  %v80_v6 = vtrunc.f32 %v22_v4  ;;  %s135_s0 = smov [#allocation5]  }
  0x14   :  { %v41_v10 = vshrl.u32 %v40_v2, 7  ;;  %s66_s18 = sshll.u32 %s135_s0, 4  ;;  %s67_s18 = int_to_ptr.vmem [resolvable:$true] %s66_s18 }
  0x15   :  { %v79_v7 = vcvt.f32.s32 %v78_v5  ;;  %v81_v8 = vcvt.f32.s32 %v80_v6  ;;  %v39_v9 = vunpack.c.0.s8 %v38_v1  ;;  %s107_s19 = scalar_lea.vmem %s67_s18, 64  ;;  %p112_p9 = scmp.lt.s32.totalorder %s67_s18, %s67_s18 }
  0x16   :  { %p108_p8 = scmp.ne.s32.totalorder %s67_s18, %s107_s19  ;;  %p113_p10 = scmp.lt.s32.totalorder %s107_s19, %s107_s19 }
  0x17   :  { %v25_v11 = vcombine.high %v79_v7, %v79_v7  ;;  %v26_v12 = vcombine.high %v81_v8, %v81_v8  ;;  %v27_v13 = vpack.c.b16 %v79_v7, %v79_v7  ;;  %v31_v14 = vpack.c.b16 %v81_v8, %v81_v8 }
  0x18   :  { %v42_v17 = vsub.s32 %v39_v9, %v41_v10  ;;  %p114_p11 = por %p113_p10, %p112_p9 }
  0x19   :  { %v29_v15 = vpack.c.b16 %v25_v11, %v25_v11  ;;  %v33_v16 = vpack.c.b16 %v26_v12, %v26_v12 }
  0x1a   :  { %p115_p12 = pnand %p114_p11, %p108_p8 }
  0x1b   :  { %v75_v18 = vpack.c.b8 %v29_v15, %v27_v13  ;;  %v76_v19 = vpack.c.b8 %v33_v16, %v31_v14 }
  0x1d   :  { %v43_v20 = vrot.slane %v75_v18, %v42_v17  ;;  %v50_v21 = vrot.slane %v76_v19, %v42_v17 }
  0x1f   :  { %v51_v22 = vcombine.low %v43_v20, %v50_v21 }
  0x21   :  { %77 = vst.sshfl [vmem:[#allocation5] sm:$0x55 pattern:$0x73625140] %v51_v22 }
  0x22   :  { %118 = shalt.err (!%p115_p12)
}
  0x23   :  { %s119_s22 = scalar_lea.hbm %s171_s1, 64 }
  0x24   :  { %p120_p13 = scmp.ne.s32.totalorder %s171_s1, %s119_s22  ;;  %p123_p0 = scmp.lt.u32.totalorder %s119_s22, %s171_s1 }
  0x26   :  { %p125_p1 = pnand %p123_p0, %p120_p13 }
  0x28   :  { %128 = shalt.err (!%p125_p1)
}
  0x29   :  { %69 = dma.vmem_to_hbm [thread:$0]  %s67_s18, 64, %s171_s1, [#allocation4]  }
  0x2a   :  { %131 = dma.done.wait [#allocation4], 64  }
  0x2b   :  { %132 = vsyncadd [#allocation4], 4294967232 }
  0x2c   :  { %73 = vsyncpa [#allocation3], 1 }
  0x2d   :  { %74 = vsyncpa [#allocation4], 1 }

</bundles_post_ra>
